<compile_context>
chip_gen: v6e
topology: v6e:2x2x1
jax: 0.10.0
libtpu: 0.0.40
codegen_flags: <defaults>
</compile_context>

<pallas_src>
import numpy as np
import jax
import jax.numpy as jnp
from jax.experimental import pallas as pl
from jax.experimental.pallas import tpu as pltpu


_LANE_TILE = 1024   # points per mask block (lane dim; multiple of 128)
_GATHER_TB = 128    # output rows per compaction block (multiple of 8)


def _round_up(x, m):
    return ((x + m - 1) // m) * m


# ----------------------------------------------------------------------------
# Kernel 1: crop mask.  coords_t is (4, Npad) so points live on the lane axis;
# bounds are compile-time scalar constants (sreg splats).  Output (1, Npad)
# int32 is lane-dense.
# ----------------------------------------------------------------------------
def _make_mask_call(loc_min, loc_max, npad, tile=_LANE_TILE):
    lo0, lo1, lo2 = (int(v) for v in loc_min)
    hi0, hi1, hi2 = (int(v) for v in loc_max)

    def kernel(ct_ref, m_ref):
        x = ct_ref[0:1, :]
        y = ct_ref[1:2, :]
        z = ct_ref[2:3, :]
        ok = ((x >= lo0) & (x < hi0)
              & (y >= lo1) & (y < hi1)
              & (z >= lo2) & (z < hi2))
        m_ref[...] = ok.astype(jnp.int32)

    return pl.pallas_call(
        kernel,
        out_shape=jax.ShapeDtypeStruct((1, npad), jnp.int32),
        grid=(npad // tile,),
        in_specs=[pl.BlockSpec((4, tile), lambda i: (0, i))],
        out_specs=pl.BlockSpec((1, tile), lambda i: (0, i)),
        compiler_params=pltpu.CompilerParams(
            dimension_semantics=("parallel",)),
    )


# ----------------------------------------------------------------------------
# Kernel 2: blocked row compaction of feats.  count/perm are scalar-prefetched
# (SMEM); feats stay in HBM (pl.ANY); each grid step gathers up to TB rows via
# manual row DMAs into a VMEM scratch and writes one contiguous (TB, C) block.
# Rows past `count` issue no DMAs and are zero-filled.
# ----------------------------------------------------------------------------
def _gather_feats(feats, perm, count, npad, tb=_GATHER_TB):
    n, c = feats.shape
    assert npad % tb == 0

    def kernel(count_ref, perm_ref, feats_hbm, out_ref, buf, sem):
        start = pl.program_id(0) * tb
        n_valid = jnp.clip(count_ref[0] - start, 0, tb)

        # issue all row-gather DMAs for this block (overlapped) ...
        def _start(r, carry):
            src = perm_ref[start + r]
            pltpu.make_async_copy(feats_hbm.at[src], buf.at[r], sem).start()
            return carry

        jax.lax.fori_loop(0, n_valid, _start, 0)

        # ... then drain them (same-size descriptors, same semaphore).
        def _wait(r, carry):
            pltpu.make_async_copy(feats_hbm.at[0], buf.at[r], sem).wait()
            return carry

        jax.lax.fori_loop(0, n_valid, _wait, 0)

        row = jax.lax.broadcasted_iota(jnp.int32, (tb, c), 0)
        out_ref[...] = jnp.where(row < n_valid, buf[...],
                                 jnp.zeros_like(buf[...]))

    grid_spec = pltpu.PrefetchScalarGridSpec(
        num_scalar_prefetch=2,                 # (count, perm) -> SMEM
        grid=(npad // tb,),
        in_specs=[pl.BlockSpec(memory_space=pl.ANY)],       # feats, raw HBM
        out_specs=pl.BlockSpec((tb, c), lambda i, cnt, prm: (i, 0)),
        scratch_shapes=[
            pltpu.VMEM((tb, c), feats.dtype),
            pltpu.SemaphoreType.DMA,
        ],
    )
    return pl.pallas_call(
        kernel,
        grid_spec=grid_spec,
        out_shape=jax.ShapeDtypeStruct((npad, c), feats.dtype),
        compiler_params=pltpu.CompilerParams(
            dimension_semantics=("arbitrary",)),
    )(count, perm, feats)


# ----------------------------------------------------------------------------
# SparseCrop module equivalent.
# ----------------------------------------------------------------------------
class SparseCrop:
    def __init__(self, loc_min, loc_max):
        # bounds are construction-time Python constants -> baked into kernel
        self.loc_min = tuple(int(v) for v in loc_min)
        self.loc_max = tuple(int(v) for v in loc_max)

    def __call__(self, coords, feats):
        coords = coords.astype(jnp.int32)
        n = coords.shape[0]
        npad = _round_up(max(n, 1), _LANE_TILE)
        pad = npad - n
        i32max = jnp.iinfo(jnp.int32).max
        # padding rows get x = INT32_MAX which always fails `x < hi` -> mask 0
        coords_p = jnp.pad(coords, ((0, pad), (0, 0)), constant_values=i32max)
        coords_t = jnp.transpose(coords_p)                   # (4, Npad)

        # --- hot path 1: per-point crop mask (Pallas, lane-dense) ---
        mask = _make_mask_call(self.loc_min, self.loc_max, npad)(coords_t)
        mask_flat = mask[0]                                  # (Npad,) int32
        count = jnp.sum(mask_flat, dtype=jnp.int32)

        # --- glue: O(N) stable partition (kept rows first, original order) ---
        dest = jnp.where(mask_flat > 0,
                         jnp.cumsum(mask_flat, dtype=jnp.int32) - 1,
                         npad)                               # dropped -> OOB
        perm = jnp.zeros((npad,), jnp.int32).at[dest].set(
            jnp.arange(npad, dtype=jnp.int32), mode="drop")  # tail stays 0

        # --- hot path 2: blocked feats compaction (Pallas manual DMA gather) ---
        feats_out = _gather_feats(feats, perm, count.reshape(1), npad)

        # coords are <1% of the moved bytes: compact with plain XLA gather
        rows = jnp.arange(npad, dtype=jnp.int32)
        coords_out = jnp.where((rows < count)[:, None],
                               jnp.take(coords_p, perm, axis=0),
                               0)
        return coords_out[:n], feats_out[:n], count


# ----------------------------------------------------------------------------
# Demo + correctness check against a numpy reference of spcrop.
# ----------------------------------------------------------------------------
if __name__ == "__main__":
    N, C = 64, 8
    loc_min = (2, 2, 2)
    loc_max = (12, 12, 12)

    key = jax.random.PRNGKey(0)
    k_xyz, k_b, k_f = jax.random.split(key, 3)
    xyz = jax.random.randint(k_xyz, (N, 3), 0, 16, dtype=jnp.int32)
    batch = jax.random.randint(k_b, (N, 1), 0, 2, dtype=jnp.int32)
    coords = jnp.concatenate([xyz, batch], axis=-1)              # (N, 4) int32
    feats = jax.random.normal(k_f, (N, C), dtype=jnp.float32)    # (N, C) f32

    crop = SparseCrop(loc_min, loc_max)
    fwd = jax.jit(lambda c, f: crop(c, f))
    out_coords, out_feats, count = jax.block_until_ready(fwd(coords, feats))

    # numpy reference (spcrop semantics)
    coords_np = np.asarray(coords)
    feats_np = np.asarray(feats)
    lo = np.asarray(loc_min, dtype=np.int32)
    hi = np.asarray(loc_max, dtype=np.int32)
    keep = np.all((coords_np[:, :3] >= lo) & (coords_np[:, :3] < hi), axis=-1)
    exp_coords = coords_np[keep]
    exp_feats = feats_np[keep]
    cnt = int(count)

    assert cnt == exp_coords.shape[0], (cnt, exp_coords.shape[0])
    np.testing.assert_array_equal(np.asarray(out_coords)[:cnt], exp_coords)
    np.testing.assert_allclose(np.asarray(out_feats)[:cnt], exp_feats,
                               rtol=0, atol=0)
    np.testing.assert_array_equal(np.asarray(out_coords)[cnt:], 0)
    np.testing.assert_array_equal(np.asarray(out_feats)[cnt:], 0.0)

    print("KERNEL_OK")
</pallas_src>

<mosaic_0001>
module attributes {stable_mosaic.version = 11 : i64} {
  func.func @kernel(%arg0: i32, %arg1: memref<4x1024xi32, #tpu.memory_space<vmem>>, %arg2: memref<1x1024xi32, #tpu.memory_space<vmem>>) attributes {dimension_semantics = [#tpu.dimension_semantics<parallel>], iteration_bounds = array<i64: 1>, scalar_prefetch = 0 : i64, scratch_operands = 0 : i64, tpu.core_type = #tpu.core_type<tc>, window_params = [{transform_indices = @transform_0, window_bounds = array<i64: 4, 1024>}, {transform_indices = @transform_1, window_bounds = array<i64: 1, 1024>}]} {
    %c0 = arith.constant 0 : index
    %c0_0 = arith.constant 0 : index
    %0 = vector.load %arg1[%c0, %c0_0] : memref<4x1024xi32, #tpu.memory_space<vmem>>, vector<1x1024xi32>
    %c1 = arith.constant 1 : index
    %c0_1 = arith.constant 0 : index
    %1 = vector.load %arg1[%c1, %c0_1] : memref<4x1024xi32, #tpu.memory_space<vmem>>, vector<1x1024xi32>
    %c2 = arith.constant 2 : index
    %c0_2 = arith.constant 0 : index
    %2 = vector.load %arg1[%c2, %c0_2] : memref<4x1024xi32, #tpu.memory_space<vmem>>, vector<1x1024xi32>
    %c2_i32 = arith.constant 2 : i32
    %3 = vector.broadcast %c2_i32 : i32 to vector<1x1024xi32>
    %4 = arith.cmpi sge, %0, %3 : vector<1x1024xi32>
    %c12_i32 = arith.constant 12 : i32
    %5 = vector.broadcast %c12_i32 : i32 to vector<1x1024xi32>
    %6 = arith.cmpi slt, %0, %5 : vector<1x1024xi32>
    %7 = arith.andi %4, %6 : vector<1x1024xi1>
    %c2_i32_3 = arith.constant 2 : i32
    %8 = vector.broadcast %c2_i32_3 : i32 to vector<1x1024xi32>
    %9 = arith.cmpi sge, %1, %8 : vector<1x1024xi32>
    %10 = arith.andi %7, %9 : vector<1x1024xi1>
    %c12_i32_4 = arith.constant 12 : i32
    %11 = vector.broadcast %c12_i32_4 : i32 to vector<1x1024xi32>
    %12 = arith.cmpi slt, %1, %11 : vector<1x1024xi32>
    %13 = arith.andi %10, %12 : vector<1x1024xi1>
    %c2_i32_5 = arith.constant 2 : i32
    %14 = vector.broadcast %c2_i32_5 : i32 to vector<1x1024xi32>
    %15 = arith.cmpi sge, %2, %14 : vector<1x1024xi32>
    %16 = arith.andi %13, %15 : vector<1x1024xi1>
    %c12_i32_6 = arith.constant 12 : i32
    %17 = vector.broadcast %c12_i32_6 : i32 to vector<1x1024xi32>
    %18 = arith.cmpi slt, %2, %17 : vector<1x1024xi32>
    %19 = arith.andi %16, %18 : vector<1x1024xi1>
    %20 = arith.extui %19 : vector<1x1024xi1> to vector<1x1024xi32>
    %c0_7 = arith.constant 0 : index
    %c0_8 = arith.constant 0 : index
    %21 = vector.load %arg2[%c0_7, %c0_8] : memref<1x1024xi32, #tpu.memory_space<vmem>>, vector<1x1024xi32>
    tpu.vector_store %arg2[%c0_7, %c0_8], %20 {strides = array<i32>} : memref<1x1024xi32, #tpu.memory_space<vmem>>, vector<1x1024xi32>,
    return
  }
  func.func @transform_0(%arg0: i32) -> (i32, i32) {
    %c0_i32 = arith.constant 0 : i32
    %c0_i32_0 = arith.constant 0 : i32
    return %c0_i32, %arg0 : i32, i32
  }
  func.func @transform_1(%arg0: i32) -> (i32, i32) {
    %c0_i32 = arith.constant 0 : i32
    %c0_i32_0 = arith.constant 0 : i32
    return %c0_i32, %arg0 : i32, i32
  }
}

module attributes {stable_mosaic.version = 11 : i64} {
  func.func @kernel(%arg0: i32, %arg1: memref<1xi32, #tpu.memory_space<smem>>, %arg2: memref<1024xi32, #tpu.memory_space<smem>>, %arg3: memref<64x8xf32, #tpu.memory_space<any>>, %arg4: memref<128x8xf32, #tpu.memory_space<vmem>>, %arg5: memref<128x8xf32, #tpu.memory_space<vmem>>, %arg6: memref<!tpu.dma_semaphore, #tpu.memory_space<semaphore_mem>>) attributes {dimension_semantics = [#tpu.dimension_semantics<arbitrary>], iteration_bounds = array<i64: 8>, scalar_prefetch = 2 : i64, scratch_operands = 2 : i64, tpu.core_type = #tpu.core_type<tc>, window_params = [{}, {transform_indices = @transform_1, window_bounds = array<i64: 128, 8>}]} {
    %c128_i32 = arith.constant 128 : i32
    %0 = arith.muli %arg0, %c128_i32 : i32
    %c0 = arith.constant 0 : index
    %1 = memref.load %arg1[%c0] : memref<1xi32, #tpu.memory_space<smem>>
    %2 = arith.subi %1, %0 : i32
    %c0_i32 = arith.constant 0 : i32
    %c128_i32_0 = arith.constant 128 : i32
    %3 = arith.maxsi %c0_i32, %2 : i32
    %4 = arith.minsi %c128_i32_0, %3 : i32
    %c0_i32_1 = arith.constant 0 : i32
    %c0_i32_2 = arith.constant 0 : i32
    %5 = arith.subi %4, %c0_i32_2 : i32
    %6 = arith.addi %c0_i32_2, %5 : i32
    %c1_i32 = arith.constant 1 : i32
    scf.for %arg7 = %c0_i32_2 to %6 step %c1_i32  : i32 {
      %16 = arith.addi %0, %arg7 : i32
      %17 = arith.index_cast %16 : i32 to index
      %18 = memref.load %arg2[%17] : memref<1024xi32, #tpu.memory_space<smem>>
      %c0_i32_10 = arith.constant 0 : i32
      %19 = tpu.memref_slice %arg3[%18, %c0_i32_10] : memref<64x8xf32, #tpu.memory_space<any>> -> memref<1x8xf32, #tpu.memory_space<any>>
      %20 = tpu.memref_squeeze %19 : memref<1x8xf32, #tpu.memory_space<any>> -> memref<8xf32, #tpu.memory_space<any>>
      %c0_i32_11 = arith.constant 0 : i32
      %21 = tpu.memref_slice %arg5[%arg7, %c0_i32_11] : memref<128x8xf32, #tpu.memory_space<vmem>> -> memref<1x8xf32, #tpu.memory_space<vmem>>
      %22 = tpu.memref_squeeze %21 : memref<1x8xf32, #tpu.memory_space<vmem>> -> memref<8xf32, #tpu.memory_space<vmem>>
      tpu.enqueue_dma source(%20 : memref<8xf32, #tpu.memory_space<any>>) target(%22 : memref<8xf32, #tpu.memory_space<vmem>>) target_semaphore(%arg6 : memref<!tpu.dma_semaphore, #tpu.memory_space<semaphore_mem>>)
    }
    %c0_i32_3 = arith.constant 0 : i32
    %c0_i32_4 = arith.constant 0 : i32
    %7 = arith.subi %4, %c0_i32_4 : i32
    %8 = arith.addi %c0_i32_4, %7 : i32
    %c1_i32_5 = arith.constant 1 : i32
    scf.for %arg7 = %c0_i32_4 to %8 step %c1_i32_5  : i32 {
      %c0_i32_10 = arith.constant 0 : i32
      %c0_i32_11 = arith.constant 0 : i32
      %16 = tpu.memref_slice %arg3[%c0_i32_10, %c0_i32_11] : memref<64x8xf32, #tpu.memory_space<any>> -> memref<1x8xf32, #tpu.memory_space<any>>
      %17 = tpu.memref_squeeze %16 : memref<1x8xf32, #tpu.memory_space<any>> -> memref<8xf32, #tpu.memory_space<any>>
      %c0_i32_12 = arith.constant 0 : i32
      %18 = tpu.memref_slice %arg5[%arg7, %c0_i32_12] : memref<128x8xf32, #tpu.memory_space<vmem>> -> memref<1x8xf32, #tpu.memory_space<vmem>>
      %19 = tpu.memref_squeeze %18 : memref<1x8xf32, #tpu.memory_space<vmem>> -> memref<8xf32, #tpu.memory_space<vmem>>
      tpu.wait_dma2 semaphore(%arg6 : memref<!tpu.dma_semaphore, #tpu.memory_space<semaphore_mem>>) src(%17 : memref<8xf32, #tpu.memory_space<any>>) dst(%19 : memref<8xf32, #tpu.memory_space<vmem>>)
    }
    %9 = tpu.iota {dimensions = array<i32: 0>} : vector<128x8xi32>
    %10 = vector.broadcast %4 : i32 to vector<128x8xi32>
    %11 = arith.cmpi slt, %9, %10 : vector<128x8xi32>
    %c0_6 = arith.constant 0 : index
    %c0_7 = arith.constant 0 : index
    %12 = vector.load %arg5[%c0_6, %c0_7] : memref<128x8xf32, #tpu.memory_space<vmem>>, vector<128x8xf32>
    %cst = arith.constant 0.000000e+00 : f32
    %13 = vector.broadcast %cst : f32 to vector<128x8xf32>
    %14 = arith.select %11, %12, %13 : vector<128x8xi1>, vector<128x8xf32>
    %c0_8 = arith.constant 0 : index
    %c0_9 = arith.constant 0 : index
    %15 = vector.load %arg4[%c0_8, %c0_9] : memref<128x8xf32, #tpu.memory_space<vmem>>, vector<128x8xf32>
    tpu.vector_store %arg4[%c0_8, %c0_9], %14 {strides = array<i32>} : memref<128x8xf32, #tpu.memory_space<vmem>>, vector<128x8xf32>,
    return
  }
  func.func @transform_1(%arg0: i32, %arg1: memref<1xi32, #tpu.memory_space<smem>>, %arg2: memref<1024xi32, #tpu.memory_space<smem>>) -> (i32, i32) {
    %c0_i32 = arith.constant 0 : i32
    %c0_i32_0 = arith.constant 0 : i32
    return %arg0, %c0_i32 : i32, i32
  }
}

</mosaic_0001>

<bundles_post_ra>
// kernel: _lambda_.2
= control target key start
LH: loop header
LB: loop body
LE: loop exit
PB: predicated region body
PF: predicated region fallthrough
CT: control target
= control target key end

     0   :  { %v33_v3 = vmov 0   ;;  %s56_s0 = inlined_call_operand.vmem [shape: s32[4,1024], index: 0, kind: input, shape index: {}]   ;;  %s57_s1 = inlined_call_operand.vmem [shape: s32[1,1024], index: 1, kind: output, shape index: {}]  }
   0x1   :  { %v8_v0 = vld [vmem:[%s56_s0] ss:$4 sm:$0xff]  ;;  %v30_v1 = vld [vmem:[%s56_s0 + $0x1] ss:$4 sm:$0xff]  ;;  %v31_v2 = vld [vmem:[%s56_s0 + $0x2] ss:$4 sm:$0xff] }
   0x2   :  { %vm13_vm0 = vcmp.ge.s32.totalorder %v8_v0, 2  ;;  %vm14_vm1 = vcmp.lt.s32.totalorder %v8_v0, 12  ;;  %vm16_vm2 = vcmp.ge.s32.totalorder %v30_v1, 2  ;;  %vm18_vm3 = vcmp.lt.s32.totalorder %v30_v1, 12 }
   0x3   :  { %vm15_vm4 = vmand %vm13_vm0, %vm14_vm1  ;;  %vm20_vm5 = vcmp.ge.s32.totalorder %v31_v2, 2  ;;  %vm22_vm7 = vcmp.lt.s32.totalorder %v31_v2, 12 }
   0x4   :  { %vm17_vm6 = vmand %vm15_vm4, %vm16_vm2 }
   0x5   :  { %vm19_vm8 = vmand %vm17_vm6, %vm18_vm3 }
   0x6   :  { %vm21_vm9 = vmand %vm19_vm8, %vm20_vm5 }
   0x7   :  { %vm23_vm10 = vmand %vm21_vm9, %vm22_vm7 }
   0x8   :  { %v24_v4 = vsel %vm23_vm10, 1, %v33_v3 }
   0x9   :  { %25 = vst [vmem:[%s57_s1] sm:$0xff] %v24_v4 }

// kernel: _lambda_.3
= control target key start
LH: loop header
LB: loop body
LE: loop exit
PB: predicated region body
PF: predicated region fallthrough
CT: control target
= control target key end

     0   :  { %s471_s0 = inlined_call_operand.<no memory space> [shape: s32[1], index: 0, kind: input, shape index: {}]   ;;  %s472_s1 = inlined_call_operand.vmem [shape: s32[1024], index: 1, kind: input, shape index: {}]   ;;  %s473_s2 = inlined_call_operand.vmem [shape: f32[64,8], index: 2, kind: input, shape index: {}]   ;;  %s474_s3 = inlined_call_operand.vmem [shape: f32[1024,8], index: 3, kind: output, shape index: {}]  }
   0x1   :  { %8 = sst [smem:[#allocation5]] %s471_s0  ;;  %s9_s16 = sshll.u32 %s472_s1, 4  ;;  %s10_s16 = int_to_ptr.vmem [resolvable:$true] %s9_s16 }
   0x2   :  { %s325_s17 = scalar_lea.vmem %s10_s16, 128  ;;  %p330_p1 = scmp.lt.s32.totalorder %s10_s16, %s10_s16 }
   0x3   :  { %p326_p0 = scmp.ne.s32.totalorder %s10_s16, %s325_s17  ;;  %p331_p2 = scmp.lt.s32.totalorder %s325_s17, %s325_s17 }
   0x5   :  { %p332_p3 = por %p331_p2, %p330_p1 }
   0x7   :  { %p333_p4 = pnand %p332_p3, %p326_p0 }
   0x9   :  { %336 = shalt.err (!%p333_p4)  }
   0xa   :  { %s365_s18 = smov [#allocation6]  }
   0xb   :  { %12 = dma.vmem_to_smem %s10_s16, 128, %s365_s18, [#allocation4] }
   0xc   :  { %349 = dma.done.wait [#allocation4], 128 }
   0xd   :  { %350 = vsyncadd [#allocation4], 4294967168 }
   0xe   :  { %14 = sfence }
   0xf   :  { %s392_s19 = smov 0  }
  0x10 LB: > { %p284_p5 = scmp.ge.s32.totalorder %s355_s19, 8  ;;  %s355_s19 = sphi %s392_s19, %s20_s19  }
  0x11   : > { %s285_s0 = sshll.u32 (!%p284_p5), %s355_s19, 4  ;;  %s60_s1 = sld [smem:[#allocation5]] (!%p284_p5) }
  0x12   : > { %45 = sbr.rel (%p284_p5) target bundleno = 85 (0x55), region = 12  ;;  %p54_p6 = scmp.lt.s32.totalorder (!%p284_p5), %s285_s0, 127 }
  0x13   : > { %s287_s20 = sshll.u32 (!%p284_p5), %s355_s19, 7 }
  0x17   : > { %s476_s0 = smov (!%p54_p6, %s285_s0), 127  ;;  %s61_s25 = ssub.s32 %s60_s1, %s287_s20 }
  0x18   : > { %s286_s21 = sshll.u32 %s476_s0, 3  ;;  %p62_p7 = scmp.gt.s32.totalorder %s61_s25, 0 }
  0x19   : > { %s403_s24 = scalar_lea.vmem %s474_s3, %s286_s21  ;;  %p288_p8 = scmp.lt.s32.totalorder %s61_s25, 128 }
  0x1a   : > { %s478_s25 = smov (!%p62_p7, %s61_s25), 0 }
  0x1b   : > { %s480_s25 = smov (!%p288_p8, %s478_s25), 128 }
  0x1c   : > { %p293_p9 = scmp.le.s32.totalorder %s480_s25, 0 }
  0x1d   : > { %s357_s26 = smov (!%p293_p9), 0  }
  0x1e   : > { %263 = sbr.rel (%p293_p9) target bundleno = 53 (0x35), region = 89 }
  0x23 LB: >> { %s72_s27 = sadd.s32 %s359_s26, %s287_s20  ;;  %s75_s5 = scalar_lea.vmem [#allocation2], %s359_s26  ;;  %s359_s26 = sphi %s357_s26, %s69_s26  }
  0x24   : >> { %s73_s28 = sld [smem:[#allocation6 + %s72_s27]] }
  0x2a   : >> { %s74_s4 = scalar_lea.vmem %s473_s2, %s73_s28 }
  0x2b   : >> { %v94_v0 = vld [vmem:[%s74_s4] sm:$0x1] }
  0x2c   : >> { %95 = vst [vmem:[%s75_s5] sm:$0x1] %v94_v0 }
  0x2d   : >> { %121 = vsyncadd [#allocation3], 16  ;;  %s69_s26 = sadd.s32 1, %s359_s26  }
  0x2e   : >> { %p68_p10 = scmp.ge.s32.totalorder %s69_s26, %s480_s25 }
  0x30   : > { %71 = sbr.rel (!%p68_p10) target bundleno = 35 (0x23), region = 95 }
  0x35 PF: > { %268 = sbr.rel (%p293_p9) target bundleno = 67 (0x43), region = 100  ;;  %s361_s6 = smov (!%p293_p9), 0  }
  0x3a LB: >> { %351 = dma.done.wait [#allocation3], 16  ;;  %s363_s6 = sphi %s361_s6, %s125_s6  }
  0x3b   : >> { %352 = vsyncadd [#allocation3], 4294967280  ;;  %s125_s6 = sadd.s32 1, %s363_s6  }
  0x3c   : >> { %p124_p11 = scmp.ge.s32.totalorder %s125_s6, %s480_s25 }
  0x3e   : > { %127 = sbr.rel (!%p124_p11) target bundleno = 58 (0x3a), region = 106 }
  0x43 PF: > { %v130_v1 = vlaneseq  ;;  %v418_v2 = vstv %s480_s25  ;;  %vm196_vm0 = vcmask 64512  }
  0x44   : > { %v164_v4 = vld [vmem:[#allocation2] sm:$0xff]  ;;  %v165_v6 = vld [vmem:[#allocation2 + $0x8] sm:$0xff]  ;;  %v166_v8 = vld [vmem:[#allocation2 + $0x10] sm:$0xff] }
  0x45   : > { %v131_v3 = vshrl.u32 %v130_v1, 7  ;;  %v167_v10 = vld [vmem:[#allocation2 + $0x18] sm:$0xff]  ;;  %v168_v13 = vld [vmem:[#allocation2 + $0x20] sm:$0xff]  ;;  %v169_v16 = vld [vmem:[#allocation2 + $0x28] sm:$0xff] }
  0x46   : > { %v170_v17 = vld [vmem:[#allocation2 + $0x30] sm:$0xff]  ;;  %v171_v19 = vld [vmem:[#allocation2 + $0x38] sm:$0xff]  ;;  %v172_v28 = vld [vmem:[#allocation2 + $0x40] sm:$0xff] }
  0x47   : > { %vm148_vm1 = vcmp.lt.s32.totalorder %v131_v3, %v418_v2  ;;  %v132_v5 = vadd.s32 8, %v131_v3  ;;  %v133_v7 = vadd.s32 16, %v131_v3  ;;  %v134_v9 = vadd.s32 24, %v131_v3  ;;  %v173_v29 = vld [vmem:[#allocation2 + $0x48] sm:$0xff]  ;;  %v174_v32 = vld [vmem:[#allocation2 + $0x50] sm:$0xff]  ;;  %v175_v34 = vld [vmem:[#allocation2 + $0x58] sm:$0xff] }
  0x48   : > { %v180_v11 = vsel %vm148_vm1, %v164_v4, 0.0  ;;  %v135_v12 = vadd.s32 32, %v131_v3  ;;  %v136_v14 = vadd.s32 40, %v131_v3  ;;  %v137_v15 = vadd.s32 48, %v131_v3  ;;  %v176_v36 = vld [vmem:[#allocation2 + $0x60] sm:$0xff]  ;;  %v177_v41 = vld [vmem:[#allocation2 + $0x68] sm:$0xff] }
  0x49   : > { %197 = vst.msk [vmem:[%s403_s24] sm:$0xff] %vm196_vm0, %v180_v11  ;;  %vm149_vm2 = vcmp.lt.s32.totalorder %v132_v5, %v418_v2  ;;  %vm150_vm3 = vcmp.lt.s32.totalorder %v133_v7, %v418_v2  ;;  %vm151_vm4 = vcmp.lt.s32.totalorder %v134_v9, %v418_v2  ;;  %v138_v18 = vadd.s32 56, %v131_v3  ;;  %v178_v42 = vld [vmem:[#allocation2 + $0x70] sm:$0xff]  ;;  %v179_v43 = vld [vmem:[#allocation2 + $0x78] sm:$0xff] }
  0x4a   : > { %v181_v20 = vsel %vm149_vm2, %v165_v6, 0.0  ;;  %v182_v21 = vsel %vm150_vm3, %v166_v8, 0.0  ;;  %v183_v22 = vsel %vm151_vm4, %v167_v10, 0.0  ;;  %vm152_vm5 = vcmp.lt.s32.totalorder %v135_v12, %v418_v2 }
  0x4b   : > { %198 = vst.msk [vmem:[%s403_s24 + $0x8] sm:$0xff] %vm196_vm0, %v181_v20  ;;  %199 = vst.msk [vmem:[%s403_s24 + $0x10] sm:$0xff] %vm196_vm0, %v182_v21  ;;  %v184_v23 = vsel %vm152_vm5, %v168_v13, 0.0  ;;  %vm153_vm6 = vcmp.lt.s32.totalorder %v136_v14, %v418_v2  ;;  %vm154_vm7 = vcmp.lt.s32.totalorder %v137_v15, %v418_v2  ;;  %vm155_vm8 = vcmp.lt.s32.totalorder %v138_v18, %v418_v2 }
  0x4c   : > { %200 = vst.msk [vmem:[%s403_s24 + $0x18] sm:$0xff] %vm196_vm0, %v183_v22  ;;  %201 = vst.msk [vmem:[%s403_s24 + $0x20] sm:$0xff] %vm196_vm0, %v184_v23  ;;  %v185_v24 = vsel %vm153_vm6, %v169_v16, 0.0  ;;  %v186_v25 = vsel %vm154_vm7, %v170_v17, 0.0  ;;  %v187_v26 = vsel %vm155_vm8, %v171_v19, 0.0  ;;  %v139_v27 = vadd.s32 64, %v131_v3 }
  0x4d   : > { %202 = vst.msk [vmem:[%s403_s24 + $0x28] sm:$0xff] %vm196_vm0, %v185_v24  ;;  %203 = vst.msk [vmem:[%s403_s24 + $0x30] sm:$0xff] %vm196_vm0, %v186_v25  ;;  %v140_v30 = vadd.s32 72, %v131_v3  ;;  %v141_v31 = vadd.s32 80, %v131_v3  ;;  %v142_v33 = vadd.s32 88, %v131_v3  ;;  %v143_v35 = vadd.s32 96, %v131_v3 }
  0x4e   : > { %204 = vst.msk [vmem:[%s403_s24 + $0x38] sm:$0xff] %vm196_vm0, %v187_v26  ;;  %vm156_vm9 = vcmp.lt.s32.totalorder %v139_v27, %v418_v2  ;;  %v144_v37 = vadd.s32 104, %v131_v3  ;;  %v145_v38 = vadd.s32 112, %v131_v3  ;;  %v146_v39 = vadd.s32 120, %v131_v3 }
  0x4f   : > { %v188_v40 = vsel %vm156_vm9, %v172_v28, 0.0  ;;  %vm157_vm10 = vcmp.lt.s32.totalorder %v140_v30, %v418_v2  ;;  %vm158_vm11 = vcmp.lt.s32.totalorder %v141_v31, %v418_v2  ;;  %vm159_vm12 = vcmp.lt.s32.totalorder %v142_v33, %v418_v2 }
  0x50   : > { %205 = vst.msk [vmem:[%s403_s24 + $0x40] sm:$0xff] %vm196_vm0, %v188_v40  ;;  %v189_v44 = vsel %vm157_vm10, %v173_v29, 0.0  ;;  %v190_v45 = vsel %vm158_vm11, %v174_v32, 0.0  ;;  %v191_v46 = vsel %vm159_vm12, %v175_v34, 0.0  ;;  %vm160_vm13 = vcmp.lt.s32.totalorder %v143_v35, %v418_v2 }
  0x51   : > { %206 = vst.msk [vmem:[%s403_s24 + $0x48] sm:$0xff] %vm196_vm0, %v189_v44  ;;  %207 = vst.msk [vmem:[%s403_s24 + $0x50] sm:$0xff] %vm196_vm0, %v190_v45  ;;  %v192_v47 = vsel %vm160_vm13, %v176_v36, 0.0  ;;  %vm161_vm14 = vcmp.lt.s32.totalorder %v144_v37, %v418_v2  ;;  %vm162_vm15 = vcmp.lt.s32.totalorder %v145_v38, %v418_v2  ;;  %vm163_vm1 = vcmp.lt.s32.totalorder %v146_v39, %v418_v2 }
  0x52   : > { %208 = vst.msk [vmem:[%s403_s24 + $0x58] sm:$0xff] %vm196_vm0, %v191_v46  ;;  %209 = vst.msk [vmem:[%s403_s24 + $0x60] sm:$0xff] %vm196_vm0, %v192_v47  ;;  %v193_v48 = vsel %vm161_vm14, %v177_v41, 0.0  ;;  %v194_v49 = vsel %vm162_vm15, %v178_v42, 0.0  ;;  %v195_v50 = vsel %vm163_vm1, %v179_v43, 0.0 }
  0x53   : > { %210 = vst.msk [vmem:[%s403_s24 + $0x68] sm:$0xff] %vm196_vm0, %v193_v48  ;;  %211 = vst.msk [vmem:[%s403_s24 + $0x70] sm:$0xff] %vm196_vm0, %v194_v49 }
  0x54   : > { %212 = vst.msk [vmem:[%s403_s24 + $0x78] sm:$0xff] %vm196_vm0, %v195_v50 }
  0x55 PF: > { %s20_s19 = sadd.s32 1, %s355_s19  }
  0x56   : > { %p17_p12 = scmp.ge.s32.totalorder %s20_s19, 9  }
  0x58   :  { %19 = sbr.rel (!%p17_p12) target bundleno = 16 (0x10), region = 117 }
  0x5d   :  { %235 = vsyncmov [#allocation3] }
  0x60   :  { %s236_s7 = vpop.sfrf %235 }
  0x61   :  { %p297_p13 = scmp.ne.s32.totalorder %s236_s7, 0 }
  0x63   :  { %240 = shalt.err (%p297_p13)  }

</bundles_post_ra>
